<compile_context>
chip_gen: v5e
topology: v5e:2x2
jax: 0.10.0
libtpu: 0.0.40
codegen_flags: <defaults>
</compile_context>

<pallas_src>
import jax
import jax.numpy as jnp
import numpy as np
from jax.experimental import pallas as pl
from jax.experimental.pallas import tpu as pltpu

EPS = 1e-5
LANE = 128


def _round_up(x, m):
    return (x + m - 1) // m * m


def _make_kernel(N, L, compute_dtype):
    inv_count = 1.0 / float(N * L)          # valid (non lane-pad) positions per channel

    def kernel(x_ref, mv_ref, ml_ref, mr_ref,
               w1_ref, b1_ref, g1_ref, be1_ref,
               w2_ref, b2_ref, g2_ref, be2_ref,
               out_ref):
        P = x_ref.shape[1]
        mv = mv_ref[...]                    # (1, P) f32    : 1 at valid columns (BN stats)
        ml = ml_ref[...]                    # (1, P) cdtype : 0 where left neighbour is torch-pad
        mr = mr_ref[...]                    # (1, P) cdtype : 0 where right neighbour is torch-pad

        def conv3(w_ref, b_ref, x):
            # Conv1d(k=3, padding=1): three accumulating MXU matmuls (f32 acc); neighbours
            # come from XLU rolls.  pltpu.roll needs shift >= 0, so "-1" is written as P-1.
            xl = pltpu.roll(x, shift=1, axis=1) * ml        # x[p-1], boundary lanes zeroed
            xr = pltpu.roll(x, shift=P - 1, axis=1) * mr    # x[p+1], boundary lanes zeroed
            h = jnp.dot(w_ref[1], x, preferred_element_type=jnp.float32)
            h = h + jnp.dot(w_ref[0], xl, preferred_element_type=jnp.float32)
            h = h + jnp.dot(w_ref[2], xr, preferred_element_type=jnp.float32)
            return h + b_ref[...]

        def bn_relu(h, g_ref, be_ref):
            # Training-mode BatchNorm1d (biased batch variance over N, L) folded into
            # per-channel scale/shift columns; stats in f32, lane-pad columns masked out.
            hm = h * mv
            mean = jnp.sum(hm, axis=1, keepdims=True) * inv_count
            var = jnp.sum(hm * h, axis=1, keepdims=True) * inv_count - mean * mean
            var = jnp.maximum(var, 0.0)
            scale = g_ref[...] * jax.lax.rsqrt(var + EPS)   # (C, 1)
            shift = be_ref[...] - mean * scale              # (C, 1)
            return jnp.maximum(h * scale + shift, 0.0)

        h1 = bn_relu(conv3(w1_ref, b1_ref, x_ref[...]), g1_ref, be1_ref)
        y2 = bn_relu(conv3(w2_ref, b2_ref, h1.astype(compute_dtype)), g2_ref, be2_ref)
        out_ref[...] = y2.astype(out_ref.dtype)

    return kernel


def _vmem_limit_bytes():
    # Per-generation scoped-VMEM limit (128 MiB on v5e/v6e, 64 MiB on v7x) with ~1/8
    # headroom for compiler scratch, instead of a hard-coded 32 MiB.
    try:
        info = pltpu.get_tpu_info()
        cap = getattr(info, "vmem_capacity_bytes", None)
        if cap:
            return int(cap) * 7 // 8
    except Exception:
        pass
    return None


def encoder_block_forward(x, params, *, compute_dtype=jnp.bfloat16):
    """x: (N, C_in, L) float32 (PyTorch NCL).

    Returns (x_cb, pooled): x_cb (N, C_out, L), pooled (N, C_out, L // 2)."""
    N, C_in, L = x.shape
    C_out = params["w1"].shape[0]
    P_data = N * L
    P = _round_up(P_data, LANE)                       # lane-dense flattened length

    # Channel-major slab (C, P): sample n occupies columns [n*L, (n+1)*L).
    def to_slab(a):
        C = a.shape[1]
        a = jnp.transpose(a, (1, 0, 2)).reshape(C, P_data)
        return jnp.pad(a, ((0, 0), (0, P - P_data))).astype(compute_dtype)

    idx = jnp.arange(P)
    valid = idx < P_data
    mask_valid = valid.astype(jnp.float32)[None, :]                       # BN-stats mask
    mask_l = (valid & (idx % L != 0)).astype(compute_dtype)[None, :]      # left-tap mask
    mask_r = (valid & (idx % L != L - 1)).astype(compute_dtype)[None, :]  # right-tap mask

    def wtaps(w):                                     # (C_out, C_in, 3) -> (3, C_out, C_in)
        return jnp.transpose(w, (2, 0, 1)).astype(compute_dtype)

    col = lambda v: v.reshape(-1, 1).astype(jnp.float32)

    kernel = _make_kernel(N, L, compute_dtype)
    vmem = lambda: pl.BlockSpec(memory_space=pltpu.MemorySpace.VMEM)

    cp_kwargs = {}
    limit = _vmem_limit_bytes()
    if limit is not None:
        cp_kwargs["vmem_limit_bytes"] = limit

    x_slab = pl.pallas_call(
        kernel,
        out_shape=jax.ShapeDtypeStruct((C_out, P), compute_dtype),
        in_specs=[vmem()] * 12,
        out_specs=vmem(),
        compiler_params=pltpu.CompilerParams(**cp_kwargs),
    )(to_slab(x), mask_valid, mask_l, mask_r,
      wtaps(params["w1"]), col(params["b1"]), col(params["g1"]), col(params["be1"]),
      wtaps(params["w2"]), col(params["b2"]), col(params["g2"]), col(params["be2"]))

    x_cb = jnp.transpose(x_slab[:, :P_data].reshape(C_out, N, L), (1, 0, 2))
    x_cb = x_cb.astype(jnp.float32)                   # model-boundary dtype
    # MaxPool1d(2) folded into the consumer: trivial pairwise max on the conv output
    # instead of a second full-width HBM writeback from the kernel.
    pooled = jnp.max(x_cb[..., :2 * (L // 2)].reshape(N, C_out, L // 2, 2), axis=-1)
    return x_cb, pooled


# ---------------- pure-JAX reference (PyTorch semantics, training-mode BN) ----------------
def _ref_forward(x, params):
    def conv1d(x, w, b):
        y = jax.lax.conv_general_dilated(
            x, w, window_strides=(1,), padding=((1, 1),),
            dimension_numbers=("NCH", "OIH", "NCH"))
        return y + b[None, :, None]

    def bn(h, g, be):
        mean = jnp.mean(h, axis=(0, 2), keepdims=True)
        var = jnp.mean((h - mean) ** 2, axis=(0, 2), keepdims=True)
        return (h - mean) / jnp.sqrt(var + EPS) * g[None, :, None] + be[None, :, None]

    h = jax.nn.relu(bn(conv1d(x, params["w1"], params["b1"]), params["g1"], params["be1"]))
    h = jax.nn.relu(bn(conv1d(h, params["w2"], params["b2"]), params["g2"], params["be2"]))
    N, C, L = h.shape
    p = jnp.max(h[..., :2 * (L // 2)].reshape(N, C, L // 2, 2), axis=-1)
    return h, p


if __name__ == "__main__":
    N, in_c, out_c, L = 2, 4, 8, 16

    key = jax.random.PRNGKey(0)
    ks = jax.random.split(key, 9)
    params = {
        "w1": 0.3 * jax.random.normal(ks[0], (out_c, in_c, 3), jnp.float32),
        "b1": 0.1 * jax.random.normal(ks[1], (out_c,), jnp.float32),
        "g1": 1.0 + 0.1 * jax.random.normal(ks[2], (out_c,), jnp.float32),
        "be1": 0.1 * jax.random.normal(ks[3], (out_c,), jnp.float32),
        "w2": 0.3 * jax.random.normal(ks[4], (out_c, out_c, 3), jnp.float32),
        "b2": 0.1 * jax.random.normal(ks[5], (out_c,), jnp.float32),
        "g2": 1.0 + 0.1 * jax.random.normal(ks[6], (out_c,), jnp.float32),
        "be2": 0.1 * jax.random.normal(ks[7], (out_c,), jnp.float32),
    }
    x = jax.random.normal(ks[8], (N, in_c, L), jnp.float32)

    ref_x, ref_p = jax.block_until_ready(_ref_forward(x, params))

    # Exact-semantics check: f32 operands, tight tolerance.
    out_x, out_p = jax.block_until_ready(
        encoder_block_forward(x, params, compute_dtype=jnp.float32))
    assert out_x.shape == (N, out_c, L), out_x.shape
    assert out_p.shape == (N, out_c, L // 2), out_p.shape
    np.testing.assert_allclose(np.asarray(out_x), np.asarray(ref_x), atol=2e-3, rtol=2e-3)
    np.testing.assert_allclose(np.asarray(out_p), np.asarray(ref_p), atol=2e-3, rtol=2e-3)

    # Perf path (default): bf16 MXU operands and slab stores, f32 BN stats / accumulation.
    out_x, out_p = jax.block_until_ready(encoder_block_forward(x, params))
    np.testing.assert_allclose(np.asarray(out_x), np.asarray(ref_x), atol=5e-2, rtol=5e-2)
    np.testing.assert_allclose(np.asarray(out_p), np.asarray(ref_p), atol=5e-2, rtol=5e-2)

    print("KERNEL_OK")
</pallas_src>

<mosaic_0001>
module attributes {stable_mosaic.version = 11 : i64} {
  func.func @kernel(%arg0: memref<4x128xf32, #tpu.memory_space<vmem>>, %arg1: memref<1x128xf32, #tpu.memory_space<vmem>>, %arg2: memref<1x128xf32, #tpu.memory_space<vmem>>, %arg3: memref<1x128xf32, #tpu.memory_space<vmem>>, %arg4: memref<3x8x4xf32, #tpu.memory_space<vmem>>, %arg5: memref<8x1xf32, #tpu.memory_space<vmem>>, %arg6: memref<8x1xf32, #tpu.memory_space<vmem>>, %arg7: memref<8x1xf32, #tpu.memory_space<vmem>>, %arg8: memref<3x8x8xf32, #tpu.memory_space<vmem>>, %arg9: memref<8x1xf32, #tpu.memory_space<vmem>>, %arg10: memref<8x1xf32, #tpu.memory_space<vmem>>, %arg11: memref<8x1xf32, #tpu.memory_space<vmem>>, %arg12: memref<8x128xf32, #tpu.memory_space<vmem>>) attributes {dimension_semantics = [], scalar_prefetch = 0 : i64, scratch_operands = 0 : i64, tpu.core_type = #tpu.core_type<tc>} {
    %c0 = arith.constant 0 : index
    %c0_0 = arith.constant 0 : index
    %0 = vector.load %arg1[%c0, %c0_0] : memref<1x128xf32, #tpu.memory_space<vmem>>, vector<1x128xf32>
    %c0_1 = arith.constant 0 : index
    %c0_2 = arith.constant 0 : index
    %1 = vector.load %arg2[%c0_1, %c0_2] : memref<1x128xf32, #tpu.memory_space<vmem>>, vector<1x128xf32>
    %c0_3 = arith.constant 0 : index
    %c0_4 = arith.constant 0 : index
    %2 = vector.load %arg3[%c0_3, %c0_4] : memref<1x128xf32, #tpu.memory_space<vmem>>, vector<1x128xf32>
    %c0_5 = arith.constant 0 : index
    %c0_6 = arith.constant 0 : index
    %3 = vector.load %arg0[%c0_5, %c0_6] : memref<4x128xf32, #tpu.memory_space<vmem>>, vector<4x128xf32>
    %c1_i32 = arith.constant 1 : i32
    %4 = tpu.dynamic_rotate %3 by %c1_i32 dim 1 : vector<4x128xf32>, i32 -> vector<4x128xf32>
    %5 = vector.broadcast %1 : vector<1x128xf32> to vector<4x128xf32>
    %6 = arith.mulf %4, %5 : vector<4x128xf32>
    %c127_i32 = arith.constant 127 : i32
    %7 = tpu.dynamic_rotate %3 by %c127_i32 dim 1 : vector<4x128xf32>, i32 -> vector<4x128xf32>
    %8 = vector.broadcast %2 : vector<1x128xf32> to vector<4x128xf32>
    %9 = arith.mulf %7, %8 : vector<4x128xf32>
    %c1 = arith.constant 1 : index
    %c0_7 = arith.constant 0 : index
    %c0_8 = arith.constant 0 : index
    %10 = vector.load %arg4[%c1, %c0_7, %c0_8] : memref<3x8x4xf32, #tpu.memory_space<vmem>>, vector<1x8x4xf32>
    %11 = vector.shape_cast %10 : vector<1x8x4xf32> to vector<8x4xf32>
    %cst = arith.constant dense<0.000000e+00> : vector<8x128xf32>
    %12 = tpu.matmul %11, %3, %cst {dimension_numbers = #tpu.dot_dimension_numbers<[1], [0], [0], [1], [0, 0, 1, 1], [], []>} : vector<8x4xf32>, vector<4x128xf32>, vector<8x128xf32> -> vector<8x128xf32>
    %c0_9 = arith.constant 0 : index
    %c0_10 = arith.constant 0 : index
    %c0_11 = arith.constant 0 : index
    %13 = vector.load %arg4[%c0_9, %c0_10, %c0_11] : memref<3x8x4xf32, #tpu.memory_space<vmem>>, vector<1x8x4xf32>
    %14 = vector.shape_cast %13 : vector<1x8x4xf32> to vector<8x4xf32>
    %cst_12 = arith.constant dense<0.000000e+00> : vector<8x128xf32>
    %15 = tpu.matmul %14, %6, %cst_12 {dimension_numbers = #tpu.dot_dimension_numbers<[1], [0], [0], [1], [0, 0, 1, 1], [], []>} : vector<8x4xf32>, vector<4x128xf32>, vector<8x128xf32> -> vector<8x128xf32>
    %16 = arith.addf %12, %15 : vector<8x128xf32>
    %c2 = arith.constant 2 : index
    %c0_13 = arith.constant 0 : index
    %c0_14 = arith.constant 0 : index
    %17 = vector.load %arg4[%c2, %c0_13, %c0_14] : memref<3x8x4xf32, #tpu.memory_space<vmem>>, vector<1x8x4xf32>
    %18 = vector.shape_cast %17 : vector<1x8x4xf32> to vector<8x4xf32>
    %cst_15 = arith.constant dense<0.000000e+00> : vector<8x128xf32>
    %19 = tpu.matmul %18, %9, %cst_15 {dimension_numbers = #tpu.dot_dimension_numbers<[1], [0], [0], [1], [0, 0, 1, 1], [], []>} : vector<8x4xf32>, vector<4x128xf32>, vector<8x128xf32> -> vector<8x128xf32>
    %20 = arith.addf %16, %19 : vector<8x128xf32>
    %c0_16 = arith.constant 0 : index
    %c0_17 = arith.constant 0 : index
    %21 = vector.load %arg5[%c0_16, %c0_17] : memref<8x1xf32, #tpu.memory_space<vmem>>, vector<8x1xf32>
    %22 = vector.broadcast %21 : vector<8x1xf32> to vector<8x128xf32>
    %23 = arith.addf %20, %22 : vector<8x128xf32>
    %24 = vector.broadcast %0 : vector<1x128xf32> to vector<8x128xf32>
    %25 = arith.mulf %23, %24 : vector<8x128xf32>
    %cst_18 = arith.constant dense<0.000000e+00> : vector<8xf32>
    %26 = vector.multi_reduction <add>, %25, %cst_18 [1] : vector<8x128xf32> to vector<8xf32>
    %27 = vector.shape_cast %26 : vector<8xf32> to vector<8x1xf32>
    %cst_19 = arith.constant 3.125000e-02 : f32
    %28 = vector.broadcast %cst_19 : f32 to vector<8x1xf32>
    %29 = arith.mulf %27, %28 : vector<8x1xf32>
    %30 = arith.mulf %25, %23 : vector<8x128xf32>
    %cst_20 = arith.constant dense<0.000000e+00> : vector<8xf32>
    %31 = vector.multi_reduction <add>, %30, %cst_20 [1] : vector<8x128xf32> to vector<8xf32>
    %32 = vector.shape_cast %31 : vector<8xf32> to vector<8x1xf32>
    %cst_21 = arith.constant 3.125000e-02 : f32
    %33 = vector.broadcast %cst_21 : f32 to vector<8x1xf32>
    %34 = arith.mulf %32, %33 : vector<8x1xf32>
    %35 = arith.mulf %29, %29 : vector<8x1xf32>
    %36 = arith.subf %34, %35 : vector<8x1xf32>
    %cst_22 = arith.constant 0.000000e+00 : f32
    %37 = vector.broadcast %cst_22 : f32 to vector<8x1xf32>
    %38 = arith.maximumf %36, %37 : vector<8x1xf32>
    %c0_23 = arith.constant 0 : index
    %c0_24 = arith.constant 0 : index
    %39 = vector.load %arg6[%c0_23, %c0_24] : memref<8x1xf32, #tpu.memory_space<vmem>>, vector<8x1xf32>
    %cst_25 = arith.constant 9.99999974E-6 : f32
    %40 = vector.broadcast %cst_25 : f32 to vector<8x1xf32>
    %41 = arith.addf %38, %40 : vector<8x1xf32>
    %42 = math.rsqrt %41 : vector<8x1xf32>
    %43 = arith.mulf %39, %42 : vector<8x1xf32>
    %c0_26 = arith.constant 0 : index
    %c0_27 = arith.constant 0 : index
    %44 = vector.load %arg7[%c0_26, %c0_27] : memref<8x1xf32, #tpu.memory_space<vmem>>, vector<8x1xf32>
    %45 = arith.mulf %29, %43 : vector<8x1xf32>
    %46 = arith.subf %44, %45 : vector<8x1xf32>
    %47 = vector.broadcast %43 : vector<8x1xf32> to vector<8x128xf32>
    %48 = arith.mulf %23, %47 : vector<8x128xf32>
    %49 = vector.broadcast %46 : vector<8x1xf32> to vector<8x128xf32>
    %50 = arith.addf %48, %49 : vector<8x128xf32>
    %cst_28 = arith.constant 0.000000e+00 : f32
    %51 = vector.broadcast %cst_28 : f32 to vector<8x128xf32>
    %52 = arith.maximumf %50, %51 : vector<8x128xf32>
    %c1_i32_29 = arith.constant 1 : i32
    %53 = tpu.dynamic_rotate %52 by %c1_i32_29 dim 1 : vector<8x128xf32>, i32 -> vector<8x128xf32>
    %54 = vector.broadcast %1 : vector<1x128xf32> to vector<8x128xf32>
    %55 = arith.mulf %53, %54 : vector<8x128xf32>
    %c127_i32_30 = arith.constant 127 : i32
    %56 = tpu.dynamic_rotate %52 by %c127_i32_30 dim 1 : vector<8x128xf32>, i32 -> vector<8x128xf32>
    %57 = vector.broadcast %2 : vector<1x128xf32> to vector<8x128xf32>
    %58 = arith.mulf %56, %57 : vector<8x128xf32>
    %c1_31 = arith.constant 1 : index
    %c0_32 = arith.constant 0 : index
    %c0_33 = arith.constant 0 : index
    %59 = vector.load %arg8[%c1_31, %c0_32, %c0_33] : memref<3x8x8xf32, #tpu.memory_space<vmem>>, vector<1x8x8xf32>
    %60 = vector.shape_cast %59 : vector<1x8x8xf32> to vector<8x8xf32>
    %cst_34 = arith.constant dense<0.000000e+00> : vector<8x128xf32>
    %61 = tpu.matmul %60, %52, %cst_34 {dimension_numbers = #tpu.dot_dimension_numbers<[1], [0], [0], [1], [0, 0, 1, 1], [], []>} : vector<8x8xf32>, vector<8x128xf32>, vector<8x128xf32> -> vector<8x128xf32>
    %c0_35 = arith.constant 0 : index
    %c0_36 = arith.constant 0 : index
    %c0_37 = arith.constant 0 : index
    %62 = vector.load %arg8[%c0_35, %c0_36, %c0_37] : memref<3x8x8xf32, #tpu.memory_space<vmem>>, vector<1x8x8xf32>
    %63 = vector.shape_cast %62 : vector<1x8x8xf32> to vector<8x8xf32>
    %cst_38 = arith.constant dense<0.000000e+00> : vector<8x128xf32>
    %64 = tpu.matmul %63, %55, %cst_38 {dimension_numbers = #tpu.dot_dimension_numbers<[1], [0], [0], [1], [0, 0, 1, 1], [], []>} : vector<8x8xf32>, vector<8x128xf32>, vector<8x128xf32> -> vector<8x128xf32>
    %65 = arith.addf %61, %64 : vector<8x128xf32>
    %c2_39 = arith.constant 2 : index
    %c0_40 = arith.constant 0 : index
    %c0_41 = arith.constant 0 : index
    %66 = vector.load %arg8[%c2_39, %c0_40, %c0_41] : memref<3x8x8xf32, #tpu.memory_space<vmem>>, vector<1x8x8xf32>
    %67 = vector.shape_cast %66 : vector<1x8x8xf32> to vector<8x8xf32>
    %cst_42 = arith.constant dense<0.000000e+00> : vector<8x128xf32>
    %68 = tpu.matmul %67, %58, %cst_42 {dimension_numbers = #tpu.dot_dimension_numbers<[1], [0], [0], [1], [0, 0, 1, 1], [], []>} : vector<8x8xf32>, vector<8x128xf32>, vector<8x128xf32> -> vector<8x128xf32>
    %69 = arith.addf %65, %68 : vector<8x128xf32>
    %c0_43 = arith.constant 0 : index
    %c0_44 = arith.constant 0 : index
    %70 = vector.load %arg9[%c0_43, %c0_44] : memref<8x1xf32, #tpu.memory_space<vmem>>, vector<8x1xf32>
    %71 = vector.broadcast %70 : vector<8x1xf32> to vector<8x128xf32>
    %72 = arith.addf %69, %71 : vector<8x128xf32>
    %73 = vector.broadcast %0 : vector<1x128xf32> to vector<8x128xf32>
    %74 = arith.mulf %72, %73 : vector<8x128xf32>
    %cst_45 = arith.constant dense<0.000000e+00> : vector<8xf32>
    %75 = vector.multi_reduction <add>, %74, %cst_45 [1] : vector<8x128xf32> to vector<8xf32>
    %76 = vector.shape_cast %75 : vector<8xf32> to vector<8x1xf32>
    %cst_46 = arith.constant 3.125000e-02 : f32
    %77 = vector.broadcast %cst_46 : f32 to vector<8x1xf32>
    %78 = arith.mulf %76, %77 : vector<8x1xf32>
    %79 = arith.mulf %74, %72 : vector<8x128xf32>
    %cst_47 = arith.constant dense<0.000000e+00> : vector<8xf32>
    %80 = vector.multi_reduction <add>, %79, %cst_47 [1] : vector<8x128xf32> to vector<8xf32>
    %81 = vector.shape_cast %80 : vector<8xf32> to vector<8x1xf32>
    %cst_48 = arith.constant 3.125000e-02 : f32
    %82 = vector.broadcast %cst_48 : f32 to vector<8x1xf32>
    %83 = arith.mulf %81, %82 : vector<8x1xf32>
    %84 = arith.mulf %78, %78 : vector<8x1xf32>
    %85 = arith.subf %83, %84 : vector<8x1xf32>
    %cst_49 = arith.constant 0.000000e+00 : f32
    %86 = vector.broadcast %cst_49 : f32 to vector<8x1xf32>
    %87 = arith.maximumf %85, %86 : vector<8x1xf32>
    %c0_50 = arith.constant 0 : index
    %c0_51 = arith.constant 0 : index
    %88 = vector.load %arg10[%c0_50, %c0_51] : memref<8x1xf32, #tpu.memory_space<vmem>>, vector<8x1xf32>
    %cst_52 = arith.constant 9.99999974E-6 : f32
    %89 = vector.broadcast %cst_52 : f32 to vector<8x1xf32>
    %90 = arith.addf %87, %89 : vector<8x1xf32>
    %91 = math.rsqrt %90 : vector<8x1xf32>
    %92 = arith.mulf %88, %91 : vector<8x1xf32>
    %c0_53 = arith.constant 0 : index
    %c0_54 = arith.constant 0 : index
    %93 = vector.load %arg11[%c0_53, %c0_54] : memref<8x1xf32, #tpu.memory_space<vmem>>, vector<8x1xf32>
    %94 = arith.mulf %78, %92 : vector<8x1xf32>
    %95 = arith.subf %93, %94 : vector<8x1xf32>
    %96 = vector.broadcast %92 : vector<8x1xf32> to vector<8x128xf32>
    %97 = arith.mulf %72, %96 : vector<8x128xf32>
    %98 = vector.broadcast %95 : vector<8x1xf32> to vector<8x128xf32>
    %99 = arith.addf %97, %98 : vector<8x128xf32>
    %cst_55 = arith.constant 0.000000e+00 : f32
    %100 = vector.broadcast %cst_55 : f32 to vector<8x128xf32>
    %101 = arith.maximumf %99, %100 : vector<8x128xf32>
    %c0_56 = arith.constant 0 : index
    %c0_57 = arith.constant 0 : index
    %102 = vector.load %arg12[%c0_56, %c0_57] : memref<8x128xf32, #tpu.memory_space<vmem>>, vector<8x128xf32>
    tpu.vector_store %arg12[%c0_56, %c0_57], %101 {strides = array<i32>} : memref<8x128xf32, #tpu.memory_space<vmem>>, vector<8x128xf32>,
    return
  }
}

</mosaic_0001>

<bundles_post_ra>
// kernel: tpu_custom_call.1
= control target key start
LH: loop header
LB: loop body
LE: loop exit
PB: predicated region body
PF: predicated region fallthrough
CT: control target
= control target key end

     0   :  { %s393_s23 = smov 127   ;;  %s531_s0 = inlined_call_operand.vmem [shape: f32[4,128], index: 0, kind: input, shape index: {}]   ;;  %s532_s1 = inlined_call_operand.vmem [shape: f32[1,128], index: 1, kind: input, shape index: {}]   ;;  %s533_s2 = inlined_call_operand.vmem [shape: f32[1,128], index: 2, kind: input, shape index: {}]   ;;  %s534_s3 = inlined_call_operand.vmem [shape: f32[1,128], index: 3, kind: input, shape index: {}]   ;;  %s535_s4 = inlined_call_operand.vmem [shape: f32[3,8,4], index: 4, kind: input, shape index: {}]   ;;  %s536_s5 = inlined_call_operand.vmem [shape: f32[8,1], index: 5, kind: input, shape index: {}]   ;;  %s537_s6 = inlined_call_operand.vmem [shape: f32[8,1], index: 6, kind: input, shape index: {}]   ;;  %s538_s7 = inlined_call_operand.vmem [shape: f32[8,1], index: 7, kind: input, shape index: {}]   ;;  %s539_s8 = inlined_call_operand.vmem [shape: f32[3,8,8], index: 8, kind: input, shape index: {}]   ;;  %s540_s9 = inlined_call_operand.vmem [shape: f32[8,1], index: 9, kind: input, shape index: {}]   ;;  %s541_s10 = inlined_call_operand.vmem [shape: f32[8,1], index: 10, kind: input, shape index: {}]   ;;  %s542_s11 = inlined_call_operand.vmem [shape: f32[8,1], index: 11, kind: input, shape index: {}]   ;;  %s543_s12 = inlined_call_operand.hbm [shape: f32[8,128], index: 12, kind: output, shape index: {}]  }
   0x1   :  { %v45_v0 = vld [vmem:[%s531_s0] sm:$0xf] }
   0x2   :  { %52 = vrot.lane.b32.xlu0 %v45_v0, %s393_s23 }
   0x3   :  { %17 = vsyncpa [#allocation3], 0  ;;  %s394_s24 = smov 1   ;;  %vm65_vm0 = vcmask 1043456   ;;  %vm61_vm1 = vcmask 31744   ;;  %v340_v1 = vld [vmem:[%s535_s4 + $0x8] sm:$0xff] }
   0x4   :  { %343 = vmatpush.msk.msra.mxu1 %vm65_vm0, %v45_v0  ;;  %v144_v2 = vld [vmem:[%s536_s5] sm:$0xff]  ;;  %v395_v3 = vmov 0   ;;  %v345_v7 = vld [vmem:[%s535_s4 + $0x10] sm:$0xff]  ;;  %vm203_vm5 = vcmask 64512   ;;  %v348_v49 = vld [vmem:[%s539_s8 + $0x8] sm:$0xff]  ;;  %s396_s27 = smov [#allocation2]  }
   0x5   :  { %344 = vmatmul.msk.f32.vlgmr.msra.gmra.mxu1 %vm61_vm1, %v340_v1  ;;  %357 = vset.pattern.permute.xlu1 %v395_v3  ;;  %v478_v4 = vld [vmem:[%s534_s3] ss:$0 sm:$0xff]  ;;  %v351_v51 = vld [vmem:[%s539_s8 + $0x10] sm:$0xff]  ;;  %s329_s28 = sshll.u32 %s396_s27, 4  ;;  %s330_s28 = int_to_ptr.vmem [resolvable:$true] %s329_s28 }
   0x6   :  { %358 = vset.pattern.permute.xlu2 %v395_v3  ;;  %147 = vperm.xlu1 %357, %v144_v2   ;;  %v489_v8 = vld [vmem:[%s533_s2] ss:$0 sm:$0xff] }
   0x7   :  { %359 = vset.pattern.permute.xlu0 %v395_v3  ;;  %v60_v11 = vld [vmem:[%s535_s4] sm:$0xff] }
   0x8   :  { %v362_v18 = vld [vmem:[%s532_s1] ss:$0 sm:$0xff] }
   0x9   :  { %v165_v35 = vld [vmem:[%s537_s6] sm:$0xff] }
   0xa   :  { %46 = vrot.lane.b32.xlu0 %v45_v0, %s394_s24  ;;  %v178_v39 = vld [vmem:[%s538_s7] sm:$0xff] }
   0xb   :  { %v276_v47 = vld [vmem:[%s540_s9] sm:$0xff] }
   0xc   :  { %v202_v54 = vld [vmem:[%s539_s8] sm:$0xff] }
  0x74   :  { %v53_v5 = vpop.permute.xlu0 %52 }
  0x75   :  { %v57_v6 = vmul.f32 %v478_v4, %v53_v5 }
  0x77   :  { %346 = vmatpush.msk.msra.mxu2 %vm65_vm0, %v57_v6 }
  0x78   :  { %347 = vmatmul.msk.f32.vlgmr.msra.gmra.mxu2 %vm61_vm1, %v345_v7  ;;  %v148_v16 = vpop.permute.xlu1 %147 }
  0x7c   :  { %v47_v9 = vpop.permute.xlu0 %46 }
  0x7d   :  { %v51_v10 = vmul.f32 %v489_v8, %v47_v9 }
  0x7f   :  { %341 = vmatpush.msk.msra.mxu0 %vm65_vm0, %v51_v10 }
  0x80   :  { %342 = vmatmul.msk.f32.vlgmr.msra.gmra.mxu0 %vm61_vm1, %v60_v11 }
  0x82   :  { %v112_v12 = vpop.f32.mrf.mxu1 }
  0xfb   :  { %v140_v14 = vpop.f32.mrf.mxu2 }
  0xfd   :  { %v86_v13 = vpop.f32.mrf.mxu0 }
  0xfe   :  { %v113_v15 = vadd.f32 %v112_v12, %v86_v13  ;;  %v294_v13 = vld [vmem:[%s541_s10] sm:$0xff]  ;;  %s331_s10 = sshll.u32 %s543_s12, 4  ;;  %s332_s10 = int_to_ptr.hbm [resolvable:$true] %s331_s10 }
 0x100   :  { %v143_v17 = vadd.f32 %v140_v14, %v113_v15 }
 0x102   :  { %v150_v19 = vadd.f32 %v148_v16, %v143_v17 }
 0x104   :  { %v154_v20 = vmul.f32 %v362_v18, %v150_v19 }
 0x106   :  { %155 = vadd.xlane.f32.xlu1 %v154_v20  ;;  %v158_v21 = vmul.f32 %v154_v20, %v150_v19 }
 0x108   :  { %159 = vadd.xlane.f32.xlu2 %v158_v21 }
 0x179   :  { %v156_v22 = vpop.xlane.xlu1 %155 }
 0x17a   :  { %v157_v23 = vmul.f32 0.03125, %v156_v22 }
 0x17b   :  { %v160_v24 = vpop.xlane.xlu2 %159 }
 0x17c   :  { %v162_v25 = vmul.f32 %v157_v23, %v157_v23  ;;  %v161_v26 = vmul.f32 0.03125, %v160_v24 }
 0x17e   :  { %v163_v27 = vsub.f32 %v161_v26, %v162_v25 }
 0x180   :  { %v164_v28 = vmax.f32 %v163_v27, 0.0 }
 0x182   :  { %v166_v29 = vadd.f32 1e-05, %v164_v28 }
 0x184   :  { %363 = vrsqrt.f32 %v166_v29  ;;  %vm173_vm3 = vweird.f32 %v166_v29 }
 0x18a   :  { %v364_v30 = vpop.eup %363 }
 0x18b   :  { %v168_v31 = vmul.f32 %v364_v30, %v166_v29  ;;  %vm174_vm2 = vweird.f32 %v364_v30 }
 0x18c   :  { %vm175_vm4 = vmor %vm173_vm3, %vm174_vm2 }
 0x18d   :  { %v169_v32 = vmul.f32 %v364_v30, %v168_v31 }
 0x18f   :  { %v170_v33 = vmul.f32 0.5, %v169_v32 }
 0x191   :  { %v171_v34 = vsub.f32 1.5, %v170_v33 }
 0x193   :  { %v172_v36 = vmul.f32 %v364_v30, %v171_v34 }
 0x195   :  { %v176_v37 = vsel %vm175_vm4, %v364_v30, %v172_v36 }
 0x196   :  { %v177_v38 = vmul.f32 %v176_v37, %v165_v35 }
 0x198   :  { %183 = vperm.xlu2 %358, %v177_v38   ;;  %v179_v40 = vmul.f32 %v177_v38, %v157_v23 }
 0x19a   :  { %v180_v41 = vsub.f32 %v178_v39, %v179_v40 }
 0x19c   :  { %189 = vperm.xlu0 %359, %v180_v41  }
 0x1f2   :  { %v184_v42 = vpop.permute.xlu2 %183 }
 0x1f3   :  { %v186_v43 = vmul.f32 %v184_v42, %v150_v19 }
 0x20e   :  { %v190_v44 = vpop.permute.xlu0 %189 }
 0x20f   :  { %v192_v45 = vadd.f32 %v190_v44, %v186_v43 }
 0x211   :  { %v193_v46 = vmax.f32 %v192_v45, 0.0 }
 0x213   :  { %197 = vrot.lane.b32.xlu2 %v193_v46, %s393_s23  ;;  %194 = vrot.lane.b32.xlu0 %v193_v46, %s394_s24 }
 0x214   :  { %245 = vmatpush.msrb.mxu0 %v193_v46 }
 0x215   :  { %350 = vmatmul.msk.f32.vlgmr.msrb.gmra.mxu0 %vm203_vm5, %v348_v49 }
 0x21b   :  { %279 = vperm.xlu0 %359, %v276_v47  }
 0x26d   :  { %v198_v48 = vpop.permute.xlu2 %197 }
 0x26e   :  { %v199_v50 = vmul.f32 %v478_v4, %v198_v48 }
 0x270   :  { %270 = vmatpush.msrb.mxu1 %v199_v50 }
 0x271   :  { %352 = vmatmul.msk.f32.vlgmr.msrb.gmra.mxu1 %vm203_vm5, %v351_v51 }
 0x285   :  { %v195_v52 = vpop.permute.xlu0 %194 }
 0x286   :  { %v196_v53 = vmul.f32 %v489_v8, %v195_v52 }
 0x288   :  { %222 = vmatpush.msra.mxu3 %v196_v53 }
 0x289   :  { %349 = vmatmul.msk.f32.vlgmr.msra.gmra.mxu3 %vm203_vm5, %v202_v54 }
 0x28d   :  { %v280_v60 = vpop.permute.xlu0 %279 }
 0x292   :  { %v247_v55 = vpop.f32.mrf.mxu0 }
 0x2ee   :  { %v272_v57 = vpop.f32.mrf.mxu1 }
 0x30c   :  { %v224_v56 = vpop.f32.mrf.mxu3 }
 0x30d   :  { %v248_v58 = vadd.f32 %v247_v55, %v224_v56 }
 0x30f   :  { %v275_v59 = vadd.f32 %v272_v57, %v248_v58 }
 0x311   :  { %v282_v61 = vadd.f32 %v280_v60, %v275_v59 }
 0x313   :  { %v283_v62 = vmul.f32 %v362_v18, %v282_v61  ;;  %v307_v18 = vld [vmem:[%s542_s11] sm:$0xff] }
 0x315   :  { %284 = vadd.xlane.f32.xlu2 %v283_v62  ;;  %v287_v63 = vmul.f32 %v283_v62, %v282_v61 }
 0x317   :  { %288 = vadd.xlane.f32.xlu0 %v287_v63 }
 0x388   :  { %v285_v0 = vpop.xlane.xlu2 %284 }
 0x389   :  { %v286_v1 = vmul.f32 0.03125, %v285_v0 }
 0x38a   :  { %v289_v2 = vpop.xlane.xlu0 %288 }
 0x38b   :  { %v291_v3 = vmul.f32 %v286_v1, %v286_v1  ;;  %v290_v4 = vmul.f32 0.03125, %v289_v2 }
 0x38d   :  { %v292_v5 = vsub.f32 %v290_v4, %v291_v3 }
 0x38f   :  { %v293_v6 = vmax.f32 %v292_v5, 0.0 }
 0x391   :  { %v295_v7 = vadd.f32 1e-05, %v293_v6 }
 0x393   :  { %365 = vrsqrt.f32 %v295_v7  ;;  %vm302_vm7 = vweird.f32 %v295_v7 }
 0x399   :  { %v366_v8 = vpop.eup %365 }
 0x39a   :  { %v297_v9 = vmul.f32 %v366_v8, %v295_v7  ;;  %vm303_vm6 = vweird.f32 %v366_v8 }
 0x39b   :  { %vm304_vm8 = vmor %vm302_vm7, %vm303_vm6 }
 0x39c   :  { %v298_v10 = vmul.f32 %v366_v8, %v297_v9 }
 0x39e   :  { %v299_v11 = vmul.f32 0.5, %v298_v10 }
 0x3a0   :  { %v300_v12 = vsub.f32 1.5, %v299_v11 }
 0x3a2   :  { %v301_v14 = vmul.f32 %v366_v8, %v300_v12 }
 0x3a4   :  { %v305_v15 = vsel %vm304_vm8, %v366_v8, %v301_v14 }
 0x3a5   :  { %v306_v16 = vmul.f32 %v305_v15, %v294_v13 }
 0x3a7   :  { %312 = vperm.xlu1 %357, %v306_v16   ;;  %v308_v17 = vmul.f32 %v306_v16, %v286_v1 }
 0x3a9   :  { %v309_v19 = vsub.f32 %v307_v18, %v308_v17 }
 0x3af   :  { %318 = vperm.xlu1 %357, %v309_v19  }
 0x419   :  { %v313_v20 = vpop.permute.xlu1 %312 }
 0x41a   :  { %v315_v21 = vmul.f32 %v313_v20, %v282_v61 }
 0x421   :  { %v319_v22 = vpop.permute.xlu1 %318 }
 0x422   :  { %v321_v23 = vadd.f32 %v319_v22, %v315_v21 }
 0x424   :  { %v322_v24 = vmax.f32 %v321_v23, 0.0 }
 0x426   :  { %323 = vst [vmem:[#allocation2] sm:$0xff] %v322_v24 }
 0x427   :  { %334 = dma.vmem_to_hbm [thread:$0]  %s330_s28, 128, %s332_s10, [#allocation3]  }
 0x428   :  { %391 = dma.done.wait [#allocation3], 128  }
 0x429   :  { %392 = vsyncadd [#allocation3], 4294967168 }
 0x42a   :  { %339 = vsyncpa [#allocation3], 1 }

</bundles_post_ra>
